<compile_context>
chip_gen: v5e
topology: v5e:2x2
jax: 0.10.0
libtpu: 0.0.40
codegen_flags: <defaults>
</compile_context>

<pallas_src>
import functools

import jax
import jax.numpy as jnp
from jax.experimental import pallas as pl
from jax.experimental.pallas import tpu as pltpu

_LANE = 128


def _round_up(a, b):
    return (a + b - 1) // b * b


def _lane_fold(q, t_tile):
    """Fold (R, t_tile) -> (R, 128) using lane-aligned static slices (VPU only)."""
    acc = q[:, 0:_LANE]
    for c in range(1, t_tile // _LANE):
        acc = acc + q[:, c * _LANE:(c + 1) * _LANE]
    return acc


def _sisdr_kernel(x_ref, t_ref, loss_ref,
                  sx_ref, st_ref, sxt_ref, stt_ref, sxx_ref,
                  *, eps, zero_mean, n_time, t_tile):
    j = pl.program_id(1)

    @pl.when(j == 0)
    def _init():
        sx_ref[...] = jnp.zeros_like(sx_ref)
        st_ref[...] = jnp.zeros_like(st_ref)
        sxt_ref[...] = jnp.zeros_like(sxt_ref)
        stt_ref[...] = jnp.zeros_like(stt_ref)
        sxx_ref[...] = jnp.zeros_like(sxx_ref)

    # Native-dtype tile on the wire; accumulate in f32 for numerics.
    x = x_ref[...].astype(jnp.float32)
    t = t_ref[...].astype(jnp.float32)

    if zero_mean:
        sx_ref[...] += _lane_fold(x, t_tile)
        st_ref[...] += _lane_fold(t, t_tile)
    sxt_ref[...] += _lane_fold(x * t, t_tile)
    stt_ref[...] += _lane_fold(t * t, t_tile)
    sxx_ref[...] += _lane_fold(x * x, t_tile)

    @pl.when(j == pl.num_programs(1) - 1)
    def _finalize():
        # One cross-lane reduce per quantity per row tile (XLU), done once.
        sxt = jnp.sum(sxt_ref[...], axis=-1, keepdims=True)
        stt = jnp.sum(stt_ref[...], axis=-1, keepdims=True)
        sxx = jnp.sum(sxx_ref[...], axis=-1, keepdims=True)
        if zero_mean:
            # Centered moments: equivalent to subtracting per-row means first.
            n = jnp.float32(n_time)
            mx = jnp.sum(sx_ref[...], axis=-1, keepdims=True) / n
            mt = jnp.sum(st_ref[...], axis=-1, keepdims=True) / n
            sxt = sxt - n * mx * mt
            stt = stt - n * mt * mt
            sxx = sxx - n * mx * mx
        alpha = sxt / (stt + eps)
        num = alpha * alpha * stt                       # ||alpha * t||^2
        den = sxx - 2.0 * alpha * sxt + alpha * alpha * stt   # ||x - alpha*t||^2
        loss_ref[...] = 10.0 * jnp.log10(num / (den + eps) + eps)


def sisdr_loss(inp, tgt, *, zero_mean=True, eps=1e-8, r_tile=256, t_tile=2048):
    """Negative SI-SDR, reduction='mean'. inp/tgt: (batch, nchs, time)."""
    assert inp.shape == tgt.shape
    b, c, t = inp.shape
    r = b * c

    # Tile sizes: multiples of (8, 128); shrink to the (padded) problem size.
    r_tile = _round_up(min(r_tile, _round_up(r, 8)), 8)
    t_tile = _round_up(min(t_tile, _round_up(t, _LANE)), _LANE)
    r_pad = _round_up(r, r_tile)
    t_pad = _round_up(t, t_tile)

    # Keep native dtype on the wire (no f32 pre-cast); zero-pad to tile grid.
    x2 = inp.reshape(r, t)
    t2 = tgt.reshape(r, t)
    if (r_pad, t_pad) != (r, t):
        pad = ((0, r_pad - r), (0, t_pad - t))
        x2 = jnp.pad(x2, pad)
        t2 = jnp.pad(t2, pad)

    kernel = functools.partial(
        _sisdr_kernel,
        eps=float(eps),
        zero_mean=bool(zero_mean),
        n_time=t,
        t_tile=t_tile,
    )

    grid = (r_pad // r_tile, t_pad // t_tile)
    bytes_in = 2 * r_pad * t_pad * x2.dtype.itemsize

    losses = pl.pallas_call(
        kernel,
        out_shape=jax.ShapeDtypeStruct((r_pad, 1), jnp.float32),
        grid_spec=pltpu.PrefetchScalarGridSpec(
            num_scalar_prefetch=0,
            grid=grid,
            in_specs=[
                pl.BlockSpec((r_tile, t_tile), lambda i, j: (i, j)),
                pl.BlockSpec((r_tile, t_tile), lambda i, j: (i, j)),
            ],
            out_specs=pl.BlockSpec((r_tile, 1), lambda i, j: (i, 0)),
            scratch_shapes=[pltpu.VMEM((r_tile, _LANE), jnp.float32)] * 5,
        ),
        compiler_params=pltpu.CompilerParams(
            dimension_semantics=("parallel", "arbitrary"),
            vmem_limit_bytes=48 * 1024 * 1024,
        ),
        cost_estimate=pl.CostEstimate(
            flops=10 * r_pad * t_pad,
            transcendentals=r_pad,
            bytes_accessed=bytes_in + 4 * r_pad,
        ),
    )(x2, t2)

    # reduction='mean' over (batch, nchs) of the valid rows, then negate.
    return -jnp.mean(losses[:r, 0])


def _sisdr_ref(inp, tgt, *, zero_mean=True, eps=1e-8):
    # Pure-JAX reference mirroring the PyTorch module.
    x = inp.astype(jnp.float32)
    t = tgt.astype(jnp.float32)
    if zero_mean:
        x = x - jnp.mean(x, axis=-1, keepdims=True)
        t = t - jnp.mean(t, axis=-1, keepdims=True)
    alpha = jnp.sum(x * t, axis=-1) / (jnp.sum(t * t, axis=-1) + eps)
    s = t * alpha[..., None]
    res = x - s
    losses = 10.0 * jnp.log10(
        jnp.sum(s * s, axis=-1) / (jnp.sum(res * res, axis=-1) + eps) + eps
    )
    return -jnp.mean(losses)


if __name__ == "__main__":
    key = jax.random.PRNGKey(0)
    k1, k2, k3, k4 = jax.random.split(key, 4)

    # Case 1: small module-shaped input (batch=2, nchs=4, time=16); grid 1x1.
    b, c, t = 2, 4, 16
    x1 = jax.random.normal(k1, (b, c, t), dtype=jnp.float32)
    y1 = jax.random.normal(k2, (b, c, t), dtype=jnp.float32)
    out1 = jax.block_until_ready(sisdr_loss(x1, y1))
    ref1 = jax.block_until_ready(_sisdr_ref(x1, y1))
    assert jnp.allclose(out1, ref1, rtol=1e-4, atol=1e-4), (out1, ref1)

    # Case 2: unaligned rows/time with multiple time tiles (exercises zero
    # padding + streaming accumulation across the reduction grid axis).
    b, c, t = 2, 3, 300
    x2 = jax.random.normal(k3, (b, c, t), dtype=jnp.float32)
    y2 = 0.7 * x2 + 0.3 * jax.random.normal(k4, (b, c, t), dtype=jnp.float32)
    out2 = jax.block_until_ready(sisdr_loss(x2, y2, t_tile=128))
    ref2 = jax.block_until_ready(_sisdr_ref(x2, y2))
    assert jnp.allclose(out2, ref2, rtol=1e-4, atol=1e-4), (out2, ref2)

    # Case 3: zero_mean=False path.
    out3 = jax.block_until_ready(sisdr_loss(x2, y2, zero_mean=False, t_tile=128))
    ref3 = jax.block_until_ready(_sisdr_ref(x2, y2, zero_mean=False))
    assert jnp.allclose(out3, ref3, rtol=1e-4, atol=1e-4), (out3, ref3)

    print("KERNEL_OK")
</pallas_src>

<mosaic_0001>
module attributes {stable_mosaic.version = 11 : i64} {
  func.func @_sisdr_kernel(%arg0: i32, %arg1: i32, %arg2: memref<8x128xf32, #tpu.memory_space<vmem>>, %arg3: memref<8x128xf32, #tpu.memory_space<vmem>>, %arg4: memref<8x1xf32, #tpu.memory_space<vmem>>, %arg5: memref<8x128xf32, #tpu.memory_space<vmem>>, %arg6: memref<8x128xf32, #tpu.memory_space<vmem>>, %arg7: memref<8x128xf32, #tpu.memory_space<vmem>>, %arg8: memref<8x128xf32, #tpu.memory_space<vmem>>, %arg9: memref<8x128xf32, #tpu.memory_space<vmem>>) attributes {dimension_semantics = [#tpu.dimension_semantics<parallel>, #tpu.dimension_semantics<arbitrary>], iteration_bounds = array<i64: 1, 1>, scalar_prefetch = 0 : i64, scratch_operands = 5 : i64, tpu.core_type = #tpu.core_type<tc>, window_params = [{transform_indices = @transform_0, window_bounds = array<i64: 8, 128>}, {transform_indices = @transform_1, window_bounds = array<i64: 8, 128>}, {transform_indices = @transform_2, window_bounds = array<i64: 8, 1>}]} {
    %c0_i32 = arith.constant 0 : i32
    %0 = arith.cmpi eq, %arg1, %c0_i32 : i32
    %1 = arith.extui %0 : i1 to i32
    %c0_i32_0 = arith.constant 0 : i32
    %2 = arith.cmpi ne, %1, %c0_i32_0 : i32
    scf.if %2 {
      %cst = arith.constant 0.000000e+00 : f32
      %26 = vector.broadcast %cst : f32 to vector<8x128xf32>
      %c0_26 = arith.constant 0 : index
      %c0_27 = arith.constant 0 : index
      %27 = vector.load %arg5[%c0_26, %c0_27] : memref<8x128xf32, #tpu.memory_space<vmem>>, vector<8x128xf32>
      tpu.vector_store %arg5[%c0_26, %c0_27], %26 {strides = array<i32>} : memref<8x128xf32, #tpu.memory_space<vmem>>, vector<8x128xf32>,
      %cst_28 = arith.constant 0.000000e+00 : f32
      %28 = vector.broadcast %cst_28 : f32 to vector<8x128xf32>
      %c0_29 = arith.constant 0 : index
      %c0_30 = arith.constant 0 : index
      %29 = vector.load %arg6[%c0_29, %c0_30] : memref<8x128xf32, #tpu.memory_space<vmem>>, vector<8x128xf32>
      tpu.vector_store %arg6[%c0_29, %c0_30], %28 {strides = array<i32>} : memref<8x128xf32, #tpu.memory_space<vmem>>, vector<8x128xf32>,
      %cst_31 = arith.constant 0.000000e+00 : f32
      %30 = vector.broadcast %cst_31 : f32 to vector<8x128xf32>
      %c0_32 = arith.constant 0 : index
      %c0_33 = arith.constant 0 : index
      %31 = vector.load %arg7[%c0_32, %c0_33] : memref<8x128xf32, #tpu.memory_space<vmem>>, vector<8x128xf32>
      tpu.vector_store %arg7[%c0_32, %c0_33], %30 {strides = array<i32>} : memref<8x128xf32, #tpu.memory_space<vmem>>, vector<8x128xf32>,
      %cst_34 = arith.constant 0.000000e+00 : f32
      %32 = vector.broadcast %cst_34 : f32 to vector<8x128xf32>
      %c0_35 = arith.constant 0 : index
      %c0_36 = arith.constant 0 : index
      %33 = vector.load %arg8[%c0_35, %c0_36] : memref<8x128xf32, #tpu.memory_space<vmem>>, vector<8x128xf32>
      tpu.vector_store %arg8[%c0_35, %c0_36], %32 {strides = array<i32>} : memref<8x128xf32, #tpu.memory_space<vmem>>, vector<8x128xf32>,
      %cst_37 = arith.constant 0.000000e+00 : f32
      %34 = vector.broadcast %cst_37 : f32 to vector<8x128xf32>
      %c0_38 = arith.constant 0 : index
      %c0_39 = arith.constant 0 : index
      %35 = vector.load %arg9[%c0_38, %c0_39] : memref<8x128xf32, #tpu.memory_space<vmem>>, vector<8x128xf32>
      tpu.vector_store %arg9[%c0_38, %c0_39], %34 {strides = array<i32>} : memref<8x128xf32, #tpu.memory_space<vmem>>, vector<8x128xf32>,
    } else {
    }
    %c0 = arith.constant 0 : index
    %c0_1 = arith.constant 0 : index
    %3 = vector.load %arg2[%c0, %c0_1] : memref<8x128xf32, #tpu.memory_space<vmem>>, vector<8x128xf32>
    %c0_2 = arith.constant 0 : index
    %c0_3 = arith.constant 0 : index
    %4 = vector.load %arg3[%c0_2, %c0_3] : memref<8x128xf32, #tpu.memory_space<vmem>>, vector<8x128xf32>
    %c0_4 = arith.constant 0 : index
    %c0_5 = arith.constant 0 : index
    %5 = vector.load %arg5[%c0_4, %c0_5] : memref<8x128xf32, #tpu.memory_space<vmem>>, vector<8x128xf32>
    %6 = arith.addf %5, %3 : vector<8x128xf32>
    %c0_6 = arith.constant 0 : index
    %c0_7 = arith.constant 0 : index
    %7 = vector.load %arg5[%c0_6, %c0_7] : memref<8x128xf32, #tpu.memory_space<vmem>>, vector<8x128xf32>
    tpu.vector_store %arg5[%c0_6, %c0_7], %6 {strides = array<i32>} : memref<8x128xf32, #tpu.memory_space<vmem>>, vector<8x128xf32>,
    %c0_8 = arith.constant 0 : index
    %c0_9 = arith.constant 0 : index
    %8 = vector.load %arg6[%c0_8, %c0_9] : memref<8x128xf32, #tpu.memory_space<vmem>>, vector<8x128xf32>
    %9 = arith.addf %8, %4 : vector<8x128xf32>
    %c0_10 = arith.constant 0 : index
    %c0_11 = arith.constant 0 : index
    %10 = vector.load %arg6[%c0_10, %c0_11] : memref<8x128xf32, #tpu.memory_space<vmem>>, vector<8x128xf32>
    tpu.vector_store %arg6[%c0_10, %c0_11], %9 {strides = array<i32>} : memref<8x128xf32, #tpu.memory_space<vmem>>, vector<8x128xf32>,
    %c0_12 = arith.constant 0 : index
    %c0_13 = arith.constant 0 : index
    %11 = vector.load %arg7[%c0_12, %c0_13] : memref<8x128xf32, #tpu.memory_space<vmem>>, vector<8x128xf32>
    %12 = arith.mulf %3, %4 : vector<8x128xf32>
    %13 = arith.addf %11, %12 : vector<8x128xf32>
    %c0_14 = arith.constant 0 : index
    %c0_15 = arith.constant 0 : index
    %14 = vector.load %arg7[%c0_14, %c0_15] : memref<8x128xf32, #tpu.memory_space<vmem>>, vector<8x128xf32>
    tpu.vector_store %arg7[%c0_14, %c0_15], %13 {strides = array<i32>} : memref<8x128xf32, #tpu.memory_space<vmem>>, vector<8x128xf32>,
    %c0_16 = arith.constant 0 : index
    %c0_17 = arith.constant 0 : index
    %15 = vector.load %arg8[%c0_16, %c0_17] : memref<8x128xf32, #tpu.memory_space<vmem>>, vector<8x128xf32>
    %16 = arith.mulf %4, %4 : vector<8x128xf32>
    %17 = arith.addf %15, %16 : vector<8x128xf32>
    %c0_18 = arith.constant 0 : index
    %c0_19 = arith.constant 0 : index
    %18 = vector.load %arg8[%c0_18, %c0_19] : memref<8x128xf32, #tpu.memory_space<vmem>>, vector<8x128xf32>
    tpu.vector_store %arg8[%c0_18, %c0_19], %17 {strides = array<i32>} : memref<8x128xf32, #tpu.memory_space<vmem>>, vector<8x128xf32>,
    %c0_20 = arith.constant 0 : index
    %c0_21 = arith.constant 0 : index
    %19 = vector.load %arg9[%c0_20, %c0_21] : memref<8x128xf32, #tpu.memory_space<vmem>>, vector<8x128xf32>
    %20 = arith.mulf %3, %3 : vector<8x128xf32>
    %21 = arith.addf %19, %20 : vector<8x128xf32>
    %c0_22 = arith.constant 0 : index
    %c0_23 = arith.constant 0 : index
    %22 = vector.load %arg9[%c0_22, %c0_23] : memref<8x128xf32, #tpu.memory_space<vmem>>, vector<8x128xf32>
    tpu.vector_store %arg9[%c0_22, %c0_23], %21 {strides = array<i32>} : memref<8x128xf32, #tpu.memory_space<vmem>>, vector<8x128xf32>,
    %c0_i32_24 = arith.constant 0 : i32
    %23 = arith.cmpi eq, %arg1, %c0_i32_24 : i32
    %24 = arith.extui %23 : i1 to i32
    %c0_i32_25 = arith.constant 0 : i32
    %25 = arith.cmpi ne, %24, %c0_i32_25 : i32
    scf.if %25 {
      %c0_26 = arith.constant 0 : index
      %c0_27 = arith.constant 0 : index
      %26 = vector.load %arg7[%c0_26, %c0_27] : memref<8x128xf32, #tpu.memory_space<vmem>>, vector<8x128xf32>
      %cst = arith.constant dense<0.000000e+00> : vector<8xf32>
      %27 = vector.multi_reduction <add>, %26, %cst [1] : vector<8x128xf32> to vector<8xf32>
      %28 = vector.shape_cast %27 : vector<8xf32> to vector<8x1xf32>
      %c0_28 = arith.constant 0 : index
      %c0_29 = arith.constant 0 : index
      %29 = vector.load %arg8[%c0_28, %c0_29] : memref<8x128xf32, #tpu.memory_space<vmem>>, vector<8x128xf32>
      %cst_30 = arith.constant dense<0.000000e+00> : vector<8xf32>
      %30 = vector.multi_reduction <add>, %29, %cst_30 [1] : vector<8x128xf32> to vector<8xf32>
      %31 = vector.shape_cast %30 : vector<8xf32> to vector<8x1xf32>
      %c0_31 = arith.constant 0 : index
      %c0_32 = arith.constant 0 : index
      %32 = vector.load %arg9[%c0_31, %c0_32] : memref<8x128xf32, #tpu.memory_space<vmem>>, vector<8x128xf32>
      %cst_33 = arith.constant dense<0.000000e+00> : vector<8xf32>
      %33 = vector.multi_reduction <add>, %32, %cst_33 [1] : vector<8x128xf32> to vector<8xf32>
      %34 = vector.shape_cast %33 : vector<8xf32> to vector<8x1xf32>
      %c0_34 = arith.constant 0 : index
      %c0_35 = arith.constant 0 : index
      %35 = vector.load %arg5[%c0_34, %c0_35] : memref<8x128xf32, #tpu.memory_space<vmem>>, vector<8x128xf32>
      %cst_36 = arith.constant dense<0.000000e+00> : vector<8xf32>
      %36 = vector.multi_reduction <add>, %35, %cst_36 [1] : vector<8x128xf32> to vector<8xf32>
      %37 = vector.shape_cast %36 : vector<8xf32> to vector<8x1xf32>
      %cst_37 = arith.constant 1.600000e+01 : f32
      %38 = vector.broadcast %cst_37 : f32 to vector<8x1xf32>
      %39 = arith.divf %37, %38 : vector<8x1xf32>
      %c0_38 = arith.constant 0 : index
      %c0_39 = arith.constant 0 : index
      %40 = vector.load %arg6[%c0_38, %c0_39] : memref<8x128xf32, #tpu.memory_space<vmem>>, vector<8x128xf32>
      %cst_40 = arith.constant dense<0.000000e+00> : vector<8xf32>
      %41 = vector.multi_reduction <add>, %40, %cst_40 [1] : vector<8x128xf32> to vector<8xf32>
      %42 = vector.shape_cast %41 : vector<8xf32> to vector<8x1xf32>
      %cst_41 = arith.constant 1.600000e+01 : f32
      %43 = vector.broadcast %cst_41 : f32 to vector<8x1xf32>
      %44 = arith.divf %42, %43 : vector<8x1xf32>
      %cst_42 = arith.constant 1.600000e+01 : f32
      %45 = vector.broadcast %cst_42 : f32 to vector<8x1xf32>
      %46 = arith.mulf %45, %39 : vector<8x1xf32>
      %47 = arith.mulf %46, %44 : vector<8x1xf32>
      %48 = arith.subf %28, %47 : vector<8x1xf32>
      %cst_43 = arith.constant 1.600000e+01 : f32
      %49 = vector.broadcast %cst_43 : f32 to vector<8x1xf32>
      %50 = arith.mulf %49, %44 : vector<8x1xf32>
      %51 = arith.mulf %50, %44 : vector<8x1xf32>
      %52 = arith.subf %31, %51 : vector<8x1xf32>
      %cst_44 = arith.constant 1.600000e+01 : f32
      %53 = vector.broadcast %cst_44 : f32 to vector<8x1xf32>
      %54 = arith.mulf %53, %39 : vector<8x1xf32>
      %55 = arith.mulf %54, %39 : vector<8x1xf32>
      %56 = arith.subf %34, %55 : vector<8x1xf32>
      %cst_45 = arith.constant 9.99999993E-9 : f32
      %57 = vector.broadcast %cst_45 : f32 to vector<8x1xf32>
      %58 = arith.addf %52, %57 : vector<8x1xf32>
      %59 = arith.divf %48, %58 : vector<8x1xf32>
      %60 = arith.mulf %59, %59 : vector<8x1xf32>
      %61 = arith.mulf %60, %52 : vector<8x1xf32>
      %cst_46 = arith.constant 2.000000e+00 : f32
      %62 = vector.broadcast %cst_46 : f32 to vector<8x1xf32>
      %63 = arith.mulf %62, %59 : vector<8x1xf32>
      %64 = arith.mulf %63, %48 : vector<8x1xf32>
      %65 = arith.subf %56, %64 : vector<8x1xf32>
      %66 = arith.mulf %59, %59 : vector<8x1xf32>
      %67 = arith.mulf %66, %52 : vector<8x1xf32>
      %68 = arith.addf %65, %67 : vector<8x1xf32>
      %cst_47 = arith.constant 9.99999993E-9 : f32
      %69 = vector.broadcast %cst_47 : f32 to vector<8x1xf32>
      %70 = arith.addf %68, %69 : vector<8x1xf32>
      %71 = arith.divf %61, %70 : vector<8x1xf32>
      %cst_48 = arith.constant 9.99999993E-9 : f32
      %72 = vector.broadcast %cst_48 : f32 to vector<8x1xf32>
      %73 = arith.addf %71, %72 : vector<8x1xf32>
      %74 = math.log %73 : vector<8x1xf32>
      %cst_49 = arith.constant 0.434294492 : f32
      %75 = vector.broadcast %cst_49 : f32 to vector<8x1xf32>
      %76 = arith.mulf %74, %75 : vector<8x1xf32>
      %cst_50 = arith.constant 1.000000e+01 : f32
      %77 = vector.broadcast %cst_50 : f32 to vector<8x1xf32>
      %78 = arith.mulf %77, %76 : vector<8x1xf32>
      %c0_51 = arith.constant 0 : index
      %c0_52 = arith.constant 0 : index
      %79 = vector.load %arg4[%c0_51, %c0_52] : memref<8x1xf32, #tpu.memory_space<vmem>>, vector<8x1xf32>
      tpu.vector_store %arg4[%c0_51, %c0_52], %78 {strides = array<i32>} : memref<8x1xf32, #tpu.memory_space<vmem>>, vector<8x1xf32>,
    } else {
    }
    return
  }
  func.func @transform_0(%arg0: i32, %arg1: i32) -> (i32, i32) {
    %c0_i32 = arith.constant 0 : i32
    return %arg0, %arg1 : i32, i32
  }
  func.func @transform_1(%arg0: i32, %arg1: i32) -> (i32, i32) {
    %c0_i32 = arith.constant 0 : i32
    return %arg0, %arg1 : i32, i32
  }
  func.func @transform_2(%arg0: i32, %arg1: i32) -> (i32, i32) {
    %c0_i32 = arith.constant 0 : i32
    %c0_i32_0 = arith.constant 0 : i32
    return %arg0, %c0_i32 : i32, i32
  }
}

</mosaic_0001>

<bundles_post_ra>
// kernel: tpu_custom_call.1
= control target key start
LH: loop header
LB: loop body
LE: loop exit
PB: predicated region body
PF: predicated region fallthrough
CT: control target
= control target key end

     0   :  { %7 = vsyncpa [#allocation8], 0  ;;  %s244_s0 = inlined_call_operand.hbm [shape: f32[8,128], index: 0, kind: input, shape index: {}]   ;;  %s245_s1 = inlined_call_operand.hbm [shape: f32[8,128], index: 1, kind: input, shape index: {}]   ;;  %s246_s2 = inlined_call_operand.vmem [shape: f32[8,1], index: 2, kind: output, shape index: {}]  }
   0x1   :  { %s14_s11 = sshll.u32 %s244_s0, 4  ;;  %s15_s11 = int_to_ptr.hbm [resolvable:$true] %s14_s11 }
   0x2   :  { %8 = vsyncpa [#allocation10], 0  ;;  %s217_s12 = smov [#allocation7]   ;;  %s25_s16 = sshll.u32 %s245_s1, 4  ;;  %s26_s16 = int_to_ptr.hbm [resolvable:$true] %s25_s16 }
   0x3   :  { %s16_s13 = sshll.u32 %s217_s12, 4  ;;  %s218_s17 = smov [#allocation9]   ;;  %s17_s13 = int_to_ptr.vmem [resolvable:$true] %s16_s13 }
   0x4   :  { %19 = dma.hbm_to_vmem [thread:$0]  %s15_s11, 128, %s17_s13, [#allocation8]  }
   0x5   :  { %s27_s18 = sshll.u32 %s218_s17, 4  ;;  %s28_s18 = int_to_ptr.vmem [resolvable:$true] %s27_s18 }
   0x6   :  { %30 = dma.hbm_to_vmem [thread:$0]  %s26_s16, 128, %s28_s18, [#allocation10]  }
   0x7   :  { %213 = dma.done.wait [#allocation8], 128  }
   0x8   :  { %214 = vsyncadd [#allocation8], 4294967168 }
   0x9   :  { %215 = dma.done.wait [#allocation10], 128  }
   0xa   :  { %216 = vsyncadd [#allocation10], 4294967168  ;;  %v49_v0 = vld [vmem:[#allocation9] sm:$0xff]  ;;  %v48_v1 = vld [vmem:[#allocation7] sm:$0xff]  ;;  %v219_v5 = vmov 16.0   ;;  %vm146_vm9 = vcmask 7168  }
   0xb   :  { %92 = vadd.xlane.f32.xlu0 %v49_v0  ;;  %81 = vadd.xlane.f32.xlu1 %v48_v1  ;;  %v65_v2 = vmul.f32 %v48_v1, %v48_v1  ;;  %v61_v3 = vmul.f32 %v49_v0, %v49_v0  ;;  %v57_v4 = vmul.f32 %v49_v0, %v48_v1  ;;  %157 = vrcp.f32 %v219_v5 }
   0xd   :  { %78 = vadd.xlane.f32.xlu2 %v65_v2 }
  0x11   :  { %v158_v6 = vpop.eup %157 }
  0x12   :  { %v84_v7 = vmul.f32 16.0, %v158_v6  ;;  %vm88_vm0 = vweird.f32 %v158_v6 }
  0x13   :  { %75 = vadd.xlane.f32.xlu0 %v61_v3  ;;  %72 = vadd.xlane.f32.xlu1 %v57_v4 }
  0x14   :  { %v85_v8 = vsub.f32 1.0, %v84_v7 }
  0x16   :  { %v86_v9 = vmul.f32 %v158_v6, %v85_v8 }
  0x18   :  { %v87_v10 = vadd.f32 %v158_v6, %v86_v9 }
  0x1a   :  { %v89_v11 = vsel %vm88_vm0, %v158_v6, %v87_v10 }
  0x7e   :  { %v93_v12 = vpop.xlane.xlu0 %92  ;;  %v82_v19 = vpop.xlane.xlu1 %81 }
  0x7f   :  { %v94_v13 = vmul.f32 %v93_v12, %v89_v11  ;;  %v90_v20 = vmul.f32 %v89_v11, %v82_v19 }
  0x80   :  { %v79_v37 = vpop.xlane.xlu2 %78 }
  0x81   :  { %v98_v14 = vmul.f32 16.0, %v94_v13  ;;  %v95_v23 = vmul.f32 16.0, %v90_v20 }
  0x83   :  { %v99_v15 = vmul.f32 %v98_v14, %v94_v13  ;;  %v96_v29 = vmul.f32 %v95_v23, %v94_v13  ;;  %v101_v36 = vmul.f32 %v95_v23, %v90_v20 }
  0x85   :  { %v102_v41 = vsub.f32 %v79_v37, %v101_v36 }
  0x86   :  { %v76_v16 = vpop.xlane.xlu0 %75  ;;  %v73_v28 = vpop.xlane.xlu1 %72 }
  0x87   :  { %v100_v17 = vsub.f32 %v76_v16, %v99_v15  ;;  %v97_v33 = vsub.f32 %v73_v28, %v96_v29 }
  0x89   :  { %v103_v18 = vadd.f32 1e-08, %v100_v17 }
  0x8b   :  { %159 = vrcp.f32 %v103_v18  ;;  %v115_v25 = vand.u32 2147483648, %v103_v18  ;;  %v113_v27 = vand.u32 2147483647, %v103_v18  ;;  %vm109_vm2 = vweird.f32 %v103_v18 }
  0x8d   :  { %v116_v31 = vor.u32 1.1754944e-38, %v115_v25  ;;  %vm114_vm4 = vcmp.eq.f32.partialorder %v113_v27, 8.507059e+37 }
  0x91   :  { %v160_v21 = vpop.eup %159 }
  0x92   :  { %v105_v22 = vmul.f32 %v160_v21, %v103_v18  ;;  %vm110_vm1 = vweird.f32 %v160_v21 }
  0x93   :  { %vm111_vm3 = vmor %vm109_vm2, %vm110_vm1 }
  0x94   :  { %v106_v24 = vsub.f32 1.0, %v105_v22 }
  0x96   :  { %v107_v26 = vmul.f32 %v160_v21, %v106_v24 }
  0x98   :  { %v108_v30 = vadd.f32 %v160_v21, %v107_v26 }
  0x9a   :  { %v112_v32 = vsel %vm111_vm3, %v160_v21, %v108_v30 }
  0x9b   :  { %v117_v34 = vsel %vm114_vm4, %v116_v31, %v112_v32 }
  0x9c   :  { %v118_v35 = vmul.f32 %v117_v34, %v97_v33 }
  0x9e   :  { %v119_v38 = vmul.f32 %v118_v35, %v118_v35  ;;  %v121_v39 = vmul.f32 2.0, %v118_v35 }
  0xa0   :  { %v122_v40 = vmul.f32 %v121_v39, %v97_v33  ;;  %v120_v42 = vmul.f32 %v119_v38, %v100_v17 }
  0xa2   :  { %v123_v43 = vsub.f32 %v102_v41, %v122_v40 }
  0xa4   :  { %v124_v44 = vadd.f32 %v123_v43, %v120_v42 }
  0xa6   :  { %v125_v45 = vadd.f32 1e-08, %v124_v44 }
  0xa8   :  { %161 = vrcp.f32 %v125_v45  ;;  %v137_v49 = vand.u32 2147483648, %v125_v45  ;;  %v135_v51 = vand.u32 2147483647, %v125_v45  ;;  %vm131_vm6 = vweird.f32 %v125_v45 }
  0xaa   :  { %v138_v53 = vor.u32 1.1754944e-38, %v137_v49  ;;  %vm136_vm8 = vcmp.eq.f32.partialorder %v135_v51, 8.507059e+37 }
  0xae   :  { %v162_v46 = vpop.eup %161 }
  0xaf   :  { %v127_v47 = vmul.f32 %v162_v46, %v125_v45  ;;  %vm132_vm5 = vweird.f32 %v162_v46 }
  0xb0   :  { %vm133_vm7 = vmor %vm131_vm6, %vm132_vm5 }
  0xb1   :  { %v128_v48 = vsub.f32 1.0, %v127_v47 }
  0xb3   :  { %v129_v50 = vmul.f32 %v162_v46, %v128_v48 }
  0xb5   :  { %v130_v52 = vadd.f32 %v162_v46, %v129_v50 }
  0xb7   :  { %v134_v54 = vsel %vm133_vm7, %v162_v46, %v130_v52 }
  0xb8   :  { %v139_v55 = vsel %vm136_vm8, %v138_v53, %v134_v54 }
  0xb9   :  { %v140_v56 = vmul.f32 %v139_v55, %v120_v42 }
  0xbb   :  { %v141_v57 = vadd.f32 1e-08, %v140_v56 }
  0xbd   :  { %163 = vlog2.f32 %v141_v57 }
  0xc3   :  { %v164_v58 = vpop.eup %163 }
  0xc4   :  { %v143_v59 = vmul.f32 0.6931472, %v164_v58 }
  0xc6   :  { %v144_v60 = vmul.f32 0.4342945, %v143_v59 }
  0xc8   :  { %v145_v61 = vmul.f32 10.0, %v144_v60 }
  0xca   :  { %147 = vst.msk [vmem:[%s246_s2] sm:$0xff] %vm146_vm9, %v145_v61 }
  0xcb   :  { %152 = vsyncpa [#allocation8], 1 }
  0xcc   :  { %153 = vsyncpa [#allocation10], 1 }

</bundles_post_ra>
